<compile_context>
chip_gen: v7x
topology: tpu7x:2x2x1
jax: 0.10.0
libtpu: 0.0.40
codegen_flags: <defaults>
</compile_context>

<pallas_src>
import functools

import jax
import jax.numpy as jnp
import numpy as np
from jax.experimental import pallas as pl
from jax.experimental.pallas import tpu as pltpu


def _pe_kernel(x_ref, o_ref, *, num_freqs, d_in, f0, include_input,
               use_recurrence):
    """x_ref: (d_in, ts, 128); o_ref: (d_out, ts, 128).

    Batch lives on the last two axes (sublane, lane) -> dense vregs.
    Output row ordering matches the PyTorch repeat/view flattening:
      rows [base + 2k*d_in : base + (2k+1)*d_in]   = sin(f_k * x)
      rows [base + (2k+1)*d_in : base + (2k+2)*d_in] = cos(f_k * x)
    """
    x = x_ref[...].astype(jnp.float32)                       # (d_in, ts, 128)
    base = 0
    if include_input:
        o_ref[0:d_in, :, :] = x.astype(o_ref.dtype)
        base = d_in

    t = x * f0                                               # f_0 * x
    s, c = jnp.sin(t), jnp.cos(t)                            # only transcendentals
    for k in range(num_freqs):                               # static unroll
        lo = base + 2 * k * d_in
        o_ref[lo:lo + d_in, :, :] = s.astype(o_ref.dtype)
        o_ref[lo + d_in:lo + 2 * d_in, :, :] = c.astype(o_ref.dtype)
        if k + 1 < num_freqs:
            if use_recurrence:
                # exact double-angle: f_{k+1} = 2 * f_k
                s, c = 2.0 * s * c, 1.0 - 2.0 * s * s
            else:
                t = t * 2.0
                s, c = jnp.sin(t), jnp.cos(t)


def positional_encoding(x, *, num_freqs=6, freq_factor=np.pi,
                        include_input=True, block_b=32768, out_dtype=None,
                        transpose_output=True):
    """JAX/Pallas equivalent of PositionalEncoding.forward.

    x: (B, d_in) -> (B, d_out) with d_out = 2*num_freqs*d_in (+ d_in if
    include_input); ordering identical to the PyTorch repeat/view/cat.

    transpose_output=False returns (d_out, B) (lane-dense, no final relayout).
    out_dtype=jnp.bfloat16 halves output HBM traffic if the consumer allows.
    """
    B, d_in = x.shape
    d_out = 2 * num_freqs * d_in + (d_in if include_input else 0)
    out_dtype = x.dtype if out_dtype is None else out_dtype

    # Double-angle recurrence is well inside a 2e-4 tolerance for typical
    # NeRF configs; for very deep frequency stacks fall back to direct eval.
    use_recurrence = num_freqs <= 10

    # Batch tile must be a multiple of 8*128 = 1024 (sublane x lane).
    tb = max(1024, (int(block_b) // 1024) * 1024)
    tb = min(tb, pl.cdiv(B, 1024) * 1024)       # don't overshoot tiny batches
    b_pad = pl.cdiv(B, tb) * tb
    ts = tb // 128
    S = b_pad // 128

    # Pad + transpose + reshape: batch onto (sublane, lane).  XLA fuses this
    # into a single relayout pass over the (small) input stream.
    x_p = jnp.pad(x, ((0, b_pad - B), (0, 0))) if b_pad != B else x
    x_t = x_p.T.reshape(d_in, S, 128)

    kernel = functools.partial(
        _pe_kernel, num_freqs=num_freqs, d_in=d_in, f0=float(freq_factor),
        include_input=include_input, use_recurrence=use_recurrence)

    out_t = pl.pallas_call(
        kernel,
        out_shape=jax.ShapeDtypeStruct((d_out, S, 128), out_dtype),
        grid=(S // ts,),
        in_specs=[pl.BlockSpec((d_in, ts, 128), lambda i: (0, i, 0))],
        out_specs=pl.BlockSpec((d_out, ts, 128), lambda i: (0, i, 0)),
        compiler_params=pltpu.CompilerParams(
            dimension_semantics=("parallel",)),
    )(x_t)

    out_db = out_t.reshape(d_out, b_pad)[:, :B]              # (d_out, B)
    if not transpose_output:
        return out_db
    return out_db.T                                          # (B, d_out)


def _reference(x, *, num_freqs=6, freq_factor=np.pi, include_input=True):
    """Pure-JAX reference mirroring the PyTorch forward exactly."""
    B, d_in = x.shape
    freqs = freq_factor * (2.0 ** jnp.arange(num_freqs, dtype=jnp.float32))
    freqs_ri = jnp.repeat(freqs, 2).reshape(1, -1, 1)
    phases = jnp.zeros((2 * num_freqs,), jnp.float32)
    phases = phases.at[1::2].set(np.pi * 0.5).reshape(1, -1, 1)
    embed = jnp.broadcast_to(x[:, None, :], (B, 2 * num_freqs, d_in))
    embed = jnp.sin(phases + embed.astype(jnp.float32) * freqs_ri)
    embed = embed.reshape(B, -1)
    if include_input:
        embed = jnp.concatenate([x, embed], axis=-1)
    return embed


if __name__ == "__main__":
    key = jax.random.PRNGKey(0)
    B, d_in, num_freqs = 2500, 3, 6      # B deliberately NOT a multiple of 1024
    # NeRF-style normalized coordinates in [-1, 1).
    x = jax.random.uniform(key, (B, d_in), dtype=jnp.float32,
                           minval=-1.0, maxval=1.0)
    ref = _reference(x, num_freqs=num_freqs)

    # Small batch tile so the run exercises a multi-step grid (+ padding).
    out = positional_encoding(x, num_freqs=num_freqs, block_b=1024)
    out = jax.block_until_ready(out)
    assert out.shape == (B, 2 * num_freqs * d_in + d_in), out.shape
    np.testing.assert_allclose(np.asarray(out), np.asarray(ref),
                               rtol=2e-4, atol=2e-4)

    # Lane-dense (d_out, B) output path (no wrapper transpose).
    out_db = jax.block_until_ready(
        positional_encoding(x, num_freqs=num_freqs, transpose_output=False))
    np.testing.assert_allclose(np.asarray(out_db).T, np.asarray(ref),
                               rtol=2e-4, atol=2e-4)

    # include_input=False path (default big tile -> single grid step).
    out2 = jax.block_until_ready(
        positional_encoding(x, num_freqs=num_freqs, include_input=False))
    ref2 = _reference(x, num_freqs=num_freqs, include_input=False)
    np.testing.assert_allclose(np.asarray(out2), np.asarray(ref2),
                               rtol=2e-4, atol=2e-4)

    # bf16 output path (cast only at the store; compute stays f32).
    out3 = jax.block_until_ready(
        positional_encoding(x, num_freqs=num_freqs, out_dtype=jnp.bfloat16))
    np.testing.assert_allclose(np.asarray(out3, dtype=np.float32),
                               np.asarray(ref), rtol=1e-2, atol=1e-2)

    print("KERNEL_OK")
</pallas_src>

<mosaic_0001>
module attributes {stable_mosaic.version = 11 : i64} {
  func.func @_pe_kernel(%arg0: i32, %arg1: memref<3x8x128xf32, #tpu.memory_space<vmem>>, %arg2: memref<39x8x128xf32, #tpu.memory_space<vmem>>) attributes {dimension_semantics = [#tpu.dimension_semantics<parallel>], iteration_bounds = array<i64: 3>, scalar_prefetch = 0 : i64, scratch_operands = 0 : i64, tpu.core_type = #tpu.core_type<tc>, window_params = [{transform_indices = @transform_0, window_bounds = array<i64: 3, 8, 128>}, {transform_indices = @transform_1, window_bounds = array<i64: 39, 8, 128>}]} {
    %c0 = arith.constant 0 : index
    %c0_0 = arith.constant 0 : index
    %c0_1 = arith.constant 0 : index
    %0 = vector.load %arg1[%c0, %c0_0, %c0_1] : memref<3x8x128xf32, #tpu.memory_space<vmem>>, vector<3x8x128xf32>
    %c0_2 = arith.constant 0 : index
    %c0_3 = arith.constant 0 : index
    %c0_4 = arith.constant 0 : index
    %1 = vector.load %arg2[%c0_2, %c0_3, %c0_4] : memref<39x8x128xf32, #tpu.memory_space<vmem>>, vector<3x8x128xf32>
    tpu.vector_store %arg2[%c0_2, %c0_3, %c0_4], %0 {strides = array<i32>} : memref<39x8x128xf32, #tpu.memory_space<vmem>>, vector<3x8x128xf32>,
    %cst = arith.constant 3.14159274 : f32
    %2 = vector.broadcast %cst : f32 to vector<3x8x128xf32>
    %3 = arith.mulf %0, %2 : vector<3x8x128xf32>
    %4 = math.sin %3 : vector<3x8x128xf32>
    %5 = math.cos %3 : vector<3x8x128xf32>
    %c3 = arith.constant 3 : index
    %c0_5 = arith.constant 0 : index
    %c0_6 = arith.constant 0 : index
    %6 = vector.load %arg2[%c3, %c0_5, %c0_6] : memref<39x8x128xf32, #tpu.memory_space<vmem>>, vector<3x8x128xf32>
    tpu.vector_store %arg2[%c3, %c0_5, %c0_6], %4 {strides = array<i32>} : memref<39x8x128xf32, #tpu.memory_space<vmem>>, vector<3x8x128xf32>,
    %c6 = arith.constant 6 : index
    %c0_7 = arith.constant 0 : index
    %c0_8 = arith.constant 0 : index
    %7 = vector.load %arg2[%c6, %c0_7, %c0_8] : memref<39x8x128xf32, #tpu.memory_space<vmem>>, vector<3x8x128xf32>
    tpu.vector_store %arg2[%c6, %c0_7, %c0_8], %5 {strides = array<i32>} : memref<39x8x128xf32, #tpu.memory_space<vmem>>, vector<3x8x128xf32>,
    %cst_9 = arith.constant 2.000000e+00 : f32
    %8 = vector.broadcast %cst_9 : f32 to vector<3x8x128xf32>
    %9 = arith.mulf %8, %4 : vector<3x8x128xf32>
    %10 = arith.mulf %9, %5 : vector<3x8x128xf32>
    %cst_10 = arith.constant 2.000000e+00 : f32
    %11 = vector.broadcast %cst_10 : f32 to vector<3x8x128xf32>
    %12 = arith.mulf %11, %4 : vector<3x8x128xf32>
    %13 = arith.mulf %12, %4 : vector<3x8x128xf32>
    %cst_11 = arith.constant 1.000000e+00 : f32
    %14 = vector.broadcast %cst_11 : f32 to vector<3x8x128xf32>
    %15 = arith.subf %14, %13 : vector<3x8x128xf32>
    %c9 = arith.constant 9 : index
    %c0_12 = arith.constant 0 : index
    %c0_13 = arith.constant 0 : index
    %16 = vector.load %arg2[%c9, %c0_12, %c0_13] : memref<39x8x128xf32, #tpu.memory_space<vmem>>, vector<3x8x128xf32>
    tpu.vector_store %arg2[%c9, %c0_12, %c0_13], %10 {strides = array<i32>} : memref<39x8x128xf32, #tpu.memory_space<vmem>>, vector<3x8x128xf32>,
    %c12 = arith.constant 12 : index
    %c0_14 = arith.constant 0 : index
    %c0_15 = arith.constant 0 : index
    %17 = vector.load %arg2[%c12, %c0_14, %c0_15] : memref<39x8x128xf32, #tpu.memory_space<vmem>>, vector<3x8x128xf32>
    tpu.vector_store %arg2[%c12, %c0_14, %c0_15], %15 {strides = array<i32>} : memref<39x8x128xf32, #tpu.memory_space<vmem>>, vector<3x8x128xf32>,
    %cst_16 = arith.constant 2.000000e+00 : f32
    %18 = vector.broadcast %cst_16 : f32 to vector<3x8x128xf32>
    %19 = arith.mulf %18, %10 : vector<3x8x128xf32>
    %20 = arith.mulf %19, %15 : vector<3x8x128xf32>
    %cst_17 = arith.constant 2.000000e+00 : f32
    %21 = vector.broadcast %cst_17 : f32 to vector<3x8x128xf32>
    %22 = arith.mulf %21, %10 : vector<3x8x128xf32>
    %23 = arith.mulf %22, %10 : vector<3x8x128xf32>
    %cst_18 = arith.constant 1.000000e+00 : f32
    %24 = vector.broadcast %cst_18 : f32 to vector<3x8x128xf32>
    %25 = arith.subf %24, %23 : vector<3x8x128xf32>
    %c15 = arith.constant 15 : index
    %c0_19 = arith.constant 0 : index
    %c0_20 = arith.constant 0 : index
    %26 = vector.load %arg2[%c15, %c0_19, %c0_20] : memref<39x8x128xf32, #tpu.memory_space<vmem>>, vector<3x8x128xf32>
    tpu.vector_store %arg2[%c15, %c0_19, %c0_20], %20 {strides = array<i32>} : memref<39x8x128xf32, #tpu.memory_space<vmem>>, vector<3x8x128xf32>,
    %c18 = arith.constant 18 : index
    %c0_21 = arith.constant 0 : index
    %c0_22 = arith.constant 0 : index
    %27 = vector.load %arg2[%c18, %c0_21, %c0_22] : memref<39x8x128xf32, #tpu.memory_space<vmem>>, vector<3x8x128xf32>
    tpu.vector_store %arg2[%c18, %c0_21, %c0_22], %25 {strides = array<i32>} : memref<39x8x128xf32, #tpu.memory_space<vmem>>, vector<3x8x128xf32>,
    %cst_23 = arith.constant 2.000000e+00 : f32
    %28 = vector.broadcast %cst_23 : f32 to vector<3x8x128xf32>
    %29 = arith.mulf %28, %20 : vector<3x8x128xf32>
    %30 = arith.mulf %29, %25 : vector<3x8x128xf32>
    %cst_24 = arith.constant 2.000000e+00 : f32
    %31 = vector.broadcast %cst_24 : f32 to vector<3x8x128xf32>
    %32 = arith.mulf %31, %20 : vector<3x8x128xf32>
    %33 = arith.mulf %32, %20 : vector<3x8x128xf32>
    %cst_25 = arith.constant 1.000000e+00 : f32
    %34 = vector.broadcast %cst_25 : f32 to vector<3x8x128xf32>
    %35 = arith.subf %34, %33 : vector<3x8x128xf32>
    %c21 = arith.constant 21 : index
    %c0_26 = arith.constant 0 : index
    %c0_27 = arith.constant 0 : index
    %36 = vector.load %arg2[%c21, %c0_26, %c0_27] : memref<39x8x128xf32, #tpu.memory_space<vmem>>, vector<3x8x128xf32>
    tpu.vector_store %arg2[%c21, %c0_26, %c0_27], %30 {strides = array<i32>} : memref<39x8x128xf32, #tpu.memory_space<vmem>>, vector<3x8x128xf32>,
    %c24 = arith.constant 24 : index
    %c0_28 = arith.constant 0 : index
    %c0_29 = arith.constant 0 : index
    %37 = vector.load %arg2[%c24, %c0_28, %c0_29] : memref<39x8x128xf32, #tpu.memory_space<vmem>>, vector<3x8x128xf32>
    tpu.vector_store %arg2[%c24, %c0_28, %c0_29], %35 {strides = array<i32>} : memref<39x8x128xf32, #tpu.memory_space<vmem>>, vector<3x8x128xf32>,
    %cst_30 = arith.constant 2.000000e+00 : f32
    %38 = vector.broadcast %cst_30 : f32 to vector<3x8x128xf32>
    %39 = arith.mulf %38, %30 : vector<3x8x128xf32>
    %40 = arith.mulf %39, %35 : vector<3x8x128xf32>
    %cst_31 = arith.constant 2.000000e+00 : f32
    %41 = vector.broadcast %cst_31 : f32 to vector<3x8x128xf32>
    %42 = arith.mulf %41, %30 : vector<3x8x128xf32>
    %43 = arith.mulf %42, %30 : vector<3x8x128xf32>
    %cst_32 = arith.constant 1.000000e+00 : f32
    %44 = vector.broadcast %cst_32 : f32 to vector<3x8x128xf32>
    %45 = arith.subf %44, %43 : vector<3x8x128xf32>
    %c27 = arith.constant 27 : index
    %c0_33 = arith.constant 0 : index
    %c0_34 = arith.constant 0 : index
    %46 = vector.load %arg2[%c27, %c0_33, %c0_34] : memref<39x8x128xf32, #tpu.memory_space<vmem>>, vector<3x8x128xf32>
    tpu.vector_store %arg2[%c27, %c0_33, %c0_34], %40 {strides = array<i32>} : memref<39x8x128xf32, #tpu.memory_space<vmem>>, vector<3x8x128xf32>,
    %c30 = arith.constant 30 : index
    %c0_35 = arith.constant 0 : index
    %c0_36 = arith.constant 0 : index
    %47 = vector.load %arg2[%c30, %c0_35, %c0_36] : memref<39x8x128xf32, #tpu.memory_space<vmem>>, vector<3x8x128xf32>
    tpu.vector_store %arg2[%c30, %c0_35, %c0_36], %45 {strides = array<i32>} : memref<39x8x128xf32, #tpu.memory_space<vmem>>, vector<3x8x128xf32>,
    %cst_37 = arith.constant 2.000000e+00 : f32
    %48 = vector.broadcast %cst_37 : f32 to vector<3x8x128xf32>
    %49 = arith.mulf %48, %40 : vector<3x8x128xf32>
    %50 = arith.mulf %49, %45 : vector<3x8x128xf32>
    %cst_38 = arith.constant 2.000000e+00 : f32
    %51 = vector.broadcast %cst_38 : f32 to vector<3x8x128xf32>
    %52 = arith.mulf %51, %40 : vector<3x8x128xf32>
    %53 = arith.mulf %52, %40 : vector<3x8x128xf32>
    %cst_39 = arith.constant 1.000000e+00 : f32
    %54 = vector.broadcast %cst_39 : f32 to vector<3x8x128xf32>
    %55 = arith.subf %54, %53 : vector<3x8x128xf32>
    %c33 = arith.constant 33 : index
    %c0_40 = arith.constant 0 : index
    %c0_41 = arith.constant 0 : index
    %56 = vector.load %arg2[%c33, %c0_40, %c0_41] : memref<39x8x128xf32, #tpu.memory_space<vmem>>, vector<3x8x128xf32>
    tpu.vector_store %arg2[%c33, %c0_40, %c0_41], %50 {strides = array<i32>} : memref<39x8x128xf32, #tpu.memory_space<vmem>>, vector<3x8x128xf32>,
    %c36 = arith.constant 36 : index
    %c0_42 = arith.constant 0 : index
    %c0_43 = arith.constant 0 : index
    %57 = vector.load %arg2[%c36, %c0_42, %c0_43] : memref<39x8x128xf32, #tpu.memory_space<vmem>>, vector<3x8x128xf32>
    tpu.vector_store %arg2[%c36, %c0_42, %c0_43], %55 {strides = array<i32>} : memref<39x8x128xf32, #tpu.memory_space<vmem>>, vector<3x8x128xf32>,
    return
  }
  func.func @transform_0(%arg0: i32) -> (i32, i32, i32) {
    %c0_i32 = arith.constant 0 : i32
    %c0_i32_0 = arith.constant 0 : i32
    %c0_i32_1 = arith.constant 0 : i32
    return %c0_i32, %arg0, %c0_i32_0 : i32, i32, i32
  }
  func.func @transform_1(%arg0: i32) -> (i32, i32, i32) {
    %c0_i32 = arith.constant 0 : i32
    %c0_i32_0 = arith.constant 0 : i32
    %c0_i32_1 = arith.constant 0 : i32
    return %c0_i32, %arg0, %c0_i32_0 : i32, i32, i32
  }
}

</mosaic_0001>

<bundles_post_ra>
// kernel: tpu_custom_call.1
= control target key start
LH: loop header
LB: loop body
LE: loop exit
PB: predicated region body
PF: predicated region fallthrough
CT: control target
= control target key end

     0   :  { %6 = vsyncpa [#allocation3], 0  ;;  %s1687_s0 = inlined_call_operand.hbm [shape: f32[3,24,128], index: 0, kind: input, shape index: {}]   ;;  %s1688_s1 = inlined_call_operand.hbm [shape: f32[39,24,128], index: 1, kind: output, shape index: {}]  }
   0x1   :  { %8 = vsyncpa [#allocation3 + $0x1], 0 }
   0x2   :  { %9 = vsyncpa [#allocation4], 0 }
   0x3   :  { %11 = vsyncpa [#allocation4 + $0x1], 0  ;;  %s1233_s6 = smov 0   ;;  %s1235_s7 = smov 0  }
   0x4   :  { %s1237_s8 = smov 0   ;;  %s1239_s9 = smov 0  }
   0x5 LB: > { %s1254_s10 = sadd.s32 4294967295, %s1207_s9   ;;  %s958_s11 = sadd.s32 4294967294, %s1207_s9   ;;  %s1207_s9 = sphi %s1239_s9, %s1702_s9   ;;  %s1203_s8 = sphi %s1237_s8, %s1701_s8   ;;  %s1199_s7 = sphi %s1235_s7, %s1700_s7   ;;  %s1195_s6 = sphi %s1233_s6, %s1699_s6  }
   0x6   : > { %s1258_s12 = sadd.s32 1, %s1207_s9   ;;  %s24_s13 = sadd.s32 1, %s1203_s8 }
   0x7   : > { %s21_s14 = ssub.s32 %s1207_s9, %s1258_s12  ;;  %p31_p0 = scmp.ne.s32.totalorder %s1203_s8, %s1199_s7 }
   0x8   : > { %p22_p1 = scmp.eq.s32.totalorder %s21_s14, 0  ;;  %p32_p2 = scmp.eq.s32.totalorder %s1207_s9, 0 }
   0x9   : > { %p37_p3 = scmp.ne.s32.totalorder %s1199_s7, %s1195_s6  ;;  %p38_p4 = scmp.eq.s32.totalorder %s1254_s10, 0 }
   0xa   : > { %s1270_s15 = scalar_select %p22_p1, %s1203_s8, %s24_s13  }
   0xb   : > { %p33_p5 = por %p32_p2, %p31_p0  ;;  %p1272_p6 = por %p38_p4, %p37_p3 }
   0xc   : > { %p61_p7 = scmp.eq.s32.totalorder %s1254_s10, 2  ;;  %p67_p8 = scmp.eq.s32.totalorder %s958_s11, 2 }
   0xd   : > { %p1053_p9 = scmp.lt.s32.totalorder %s1207_s9, 3  ;;  %s87_s19 = sand.u32 1, %s1203_s8  }
   0xe   : > { %p1278_p10 = por %p61_p7, %p31_p0  ;;  %p1282_p11 = por %p67_p8, %p37_p3 }
   0xf   : > { %s961_s20 = sshll.u32 %s1207_s9, 7  ;;  %s1026_s21 = smul.u32 24, %s87_s19 }
  0x10   : > { %s1691_s17 = scalar_select %p1278_p10, 1, 0 }
  0x11   : > { %s1692_s18 = scalar_select %p1282_p11, 1, 0 }
  0x12   : > { %s1291_s24 = scalar_lea.hbm %s1687_s0, %s961_s20  ;;  %p1293_p12 = pnand %p1053_p9, %p33_p5 }
  0x13   : > { %s91_s26 = scalar_lea.vmem [#allocation2], %s1026_s21  ;;  %s1300_s28 = scalar_lea.sflag [#allocation3], %s87_s19 }
  0x14   : > { %s97_s27 = sshll.u32 %s91_s26, 4  ;;  %s1111_s29 = scalar_lea.hbm %s1291_s24, 384  ;;  %s1297_s27 = int_to_ptr.vmem [resolvable:$true] %s97_s27 }
  0x15   : > { %p1112_p0 = scmp.ne.s32.totalorder %s1291_s24, %s1111_s29  ;;  %p1113_p1 = pneg %p1293_p12 }
  0x16   : > { %s1116_s3 = scalar_lea.hbm %s1687_s0, 1152  ;;  %p1117_p4 = scmp.lt.u32.totalorder %s1291_s24, %s1687_s0 }
  0x17   : > { %p1114_p2 = pnand %p1113_p1, %p1112_p0  ;;  %p1118_p5 = scmp.lt.u32.totalorder %s1116_s3, %s1111_s29 }
  0x18   : > { %p1120_p8 = scmp.lt.u32.totalorder %s1111_s29, %s1291_s24 }
  0x19   : > { %p1115_p3 = pneg %p1114_p2  ;;  %p1119_p7 = por %p1118_p5, %p1117_p4 }
  0x1b   : > { %p1121_p9 = por %p1120_p8, %p1119_p7 }
  0x1d   : > { %p1122_p13 = pnand %p1121_p9, %p1115_p3 }
  0x1f   : > { %1125 = shalt.err (!%p1122_p13)
}
  0x20   : > { %s1126_s11 = scalar_lea.vmem %s1297_s27, 384  ;;  %s1209_s13 = smov [#allocation2]  }
  0x21   : > { %p1127_p0 = scmp.ne.s32.totalorder %s1297_s27, %s1126_s11  ;;  %s1131_s14 = sshll.u32 %s1209_s13, 4  ;;  %s1132_s14 = int_to_ptr.vmem [resolvable:$false] %s1131_s14 }
  0x22   : > { %s1133_s19 = scalar_lea.vmem %s1132_s14, 768  ;;  %p1134_p10 = scmp.lt.s32.totalorder %s1297_s27, %s1132_s14 }
  0x23   : > { %p1129_p2 = pnand %p1127_p0, %p1113_p1  ;;  %p1135_p4 = scmp.lt.s32.totalorder %s1133_s19, %s1126_s11 }
  0x25   : > { %p1130_p11 = pneg %p1129_p2  ;;  %p1136_p5 = por %p1135_p4, %p1134_p10 }
  0x27   : > { %p1137_p7 = pnand %p1136_p5, %p1130_p11 }
  0x29   : > { %1140 = shalt.err (!%p1137_p7)
}
  0x2a   : > { %s1210_s20 = smov 384   ;;  %s1211_s21 = smov 128  }
  0x2b   : > { %s1212_s22 = smov 8   ;;  %p105_p13 = scmp.lt.s32.totalorder %s1207_s9, 4 }
  0x2c   : > { %1048 = dma.hbm_to_vmem [thread:$0]  (!%p1293_p12), %s1291_s24, 384, %s1297_s27, %s1300_s28, %s1210_s20, %s1211_s21, %s1212_s22  }
  0x2d   : > { %p1694_p1 = scmp.ge.s32.totalorder %s1207_s9, 1 }
  0x2f   : > { %p106_p3 = pnand %p1694_p1, %p105_p13 }
  0x30   : > { %s1332_s23 = sand.u32 (!%p106_p3), 1, %s1199_s7  }
  0x31   : > { %109 = sbr.rel (%p106_p3) target bundleno = 199 (0xc7), region = 24  ;;  %s112_s29 = scalar_lea.sflag (!%p106_p3), [#allocation3], %s1332_s23 }
  0x32   : > { %s1027_s26 = smul.u32 (!%p106_p3), 24, %s1332_s23 }
  0x34   : > { %s115_s30 = scalar_lea.vmem (!%p106_p3), [#allocation2], %s1027_s26 }
  0x38   : > { %1186 = dma.done.wait (%p1272_p6), %s112_s29, 384  }
  0x39   : > { %1188 = vsyncadd (%p1272_p6), %s112_s29, 4294966912  ;;  %s1028_s24 = smul.u32 312, %s1332_s23  ;;  %v134_v0 = vld [vmem:[%s115_s30] sm:$0xff]  ;;  %v135_v1 = vld [vmem:[%s115_s30 + $0x8] sm:$0xff]  ;;  %v1213_v37 = vmov 2102212464  }
  0x3a   : > { %v136_v2 = vld [vmem:[%s115_s30 + $0x10] sm:$0xff]  ;;  %v1344_v3 = vmul.f32 3.1415927, %v134_v0  ;;  %v1347_v4 = vmul.f32 3.1415927, %v135_v1  ;;  %s1023_s16 = sshll.u32 %s1254_s10, 7 }
  0x3b   : > { %s1341_s25 = scalar_lea.vmem [#allocation5], %s1028_s24  ;;  %v1350_v5 = vmul.f32 3.1415927, %v136_v2  ;;  %v1214_v39 = vmov 920167782   ;;  %s1640_s3 = scalar_lea.hbm %s1688_s1, %s1023_s16 }
  0x3c   : > { %137 = vst [vmem:[%s1341_s25] sm:$0xff] %v134_v0  ;;  %138 = vst [vmem:[%s1341_s25 + $0x8] sm:$0xff] %v135_v1  ;;  %v146_v6 = vand.u32 2139095040, %v1344_v3  ;;  %v250_v7 = vand.u32 2139095040, %v1347_v4  ;;  %v143_v9 = vand.u32 2147483647, %v1344_v3  ;;  %s885_s27 = sshll.u32 %s1341_s25, 4  ;;  %s1642_s27 = int_to_ptr.vmem [resolvable:$true] %s885_s27 }
  0x3d   : > { %139 = vst [vmem:[%s1341_s25 + $0x10] sm:$0xff] %v136_v2  ;;  %v354_v8 = vand.u32 2139095040, %v1350_v5  ;;  %v247_v10 = vand.u32 2147483647, %v1347_v4  ;;  %v351_v19 = vand.u32 2147483647, %v1350_v5 }
  0x3e   : > { %v147_v11 = vshrl.u32 %v146_v6, 23  ;;  %v251_v12 = vshrl.u32 %v250_v7, 23  ;;  %v150_v14 = vand.u32 8388607, %v143_v9  ;;  %v1215_v46 = vmov 1326507024  }
  0x3f   : > { %v355_v13 = vshrl.u32 %v354_v8, 23  ;;  %v254_v15 = vand.u32 8388607, %v247_v10  ;;  %v358_v25 = vand.u32 8388607, %v351_v19  ;;  %s873_s10 = scalar_lea.sflag [#allocation4], %s1332_s23 }
  0x40   : > { %v963_v16 = vadd.s32 4294967169, %v147_v11  ;;  %v967_v17 = vadd.s32 4294967169, %v251_v12  ;;  %v151_v23 = vor.u32 8388608, %v150_v14  ;;  %v1216_v59 = vmov 683565275   ;;  %s1141_s4 = scalar_lea.vmem %s1642_s27, 4992 }
  0x41   : > { %v971_v18 = vadd.s32 4294967169, %v355_v13  ;;  %v255_v24 = vor.u32 8388608, %v254_v15  ;;  %v359_v35 = vor.u32 8388608, %v358_v25  ;;  %v1217_v6 = vmov 2475754826   ;;  %p1142_p6 = scmp.ne.s32.totalorder %s1642_s27, %s1141_s4  ;;  %p1697_p10 = scmp.ne.s32.totalorder %s1691_s17, 0 }
  0x42   : > { %v153_v20 = vadd.s32 1, %v963_v16  ;;  %v257_v21 = vadd.s32 1, %v967_v17  ;;  %v1368_v33 = vshll.u32 %v151_v23, 8  ;;  %v1218_v13 = vmov 2131351028   ;;  %s1219_s5 = smov [#allocation5]  }
  0x43   : > { %v361_v22 = vadd.s32 1, %v971_v18  ;;  %v1370_v34 = vshll.u32 %v255_v24, 8  ;;  %v1393_v61 = vshll.u32 %v359_v35, 8  ;;  %p1143_p11 = pnand %p1142_p6, %p1697_p10  ;;  %s1145_s11 = sshll.u32 %s1219_s5, 4  ;;  %s1146_s11 = int_to_ptr.vmem [resolvable:$false] %s1145_s11 }
  0x44   : > { %vm154_vm0 = vcmp.gt.s32.totalorder %v153_v20, 0  ;;  %vm258_vm1 = vcmp.gt.s32.totalorder %v257_v21, 0  ;;  %s1147_s13 = scalar_lea.vmem %s1146_s11, 9984  ;;  %p1148_p8 = scmp.lt.s32.totalorder %s1642_s27, %s1146_s11 }
  0x45   : > { %vm362_vm2 = vcmp.gt.s32.totalorder %v361_v22, 0  ;;  %v155_v26 = vsel %vm154_vm0, %v153_v20, 0  ;;  %v259_v27 = vsel %vm258_vm1, %v257_v21, 0  ;;  %p1144_p12 = pneg %p1143_p11  ;;  %p1149_p9 = scmp.lt.s32.totalorder %s1147_s13, %s1141_s4 }
  0x46   : > { %v363_v28 = vsel %vm362_vm2, %v361_v22, 0  ;;  %v1364_v29 = vshrl.u32 %v155_v26, 5  ;;  %v157_v30 = vand.u32 31, %v155_v26  ;;  %v261_v31 = vand.u32 31, %v259_v27 }
  0x47   : > { %v1366_v32 = vand.u32 31, %v363_v28  ;;  %v1373_v41 = vshrl.u32 %v259_v27, 5  ;;  %v1376_v44 = vshrl.u32 %v363_v28, 5  ;;  %p1150_p0 = por %p1149_p9, %p1148_p8 }
  0x48   : > { %v158_v36 = vsub.s32 32, %v157_v30  ;;  %v169_v38 = vshll.u32 %v1213_v37, %v157_v30  ;;  %v172_v40 = vshll.u32 %v1214_v39, %v157_v30  ;;  %vm178_vm3 = vcmp.lt.s32.totalorder %v1364_v29, 4 }
  0x49   : > { %v262_v42 = vsub.s32 32, %v261_v31  ;;  %v276_v43 = vshll.u32 %v1214_v39, %v261_v31  ;;  %v273_v48 = vshll.u32 %v1213_v37, %v261_v31  ;;  %v1380_v49 = vsub.s32 32, %v1366_v32  ;;  %p1151_p2 = pnand %p1150_p0, %p1144_p12 }
  0x4a   : > { %v170_v45 = vshrl.u32 %v1214_v39, %v158_v36  ;;  %v173_v47 = vshrl.u32 %v1215_v46, %v158_v36  ;;  %v377_v52 = vshll.u32 %v1213_v37, %v1366_v32  ;;  %v1385_v53 = vshll.u32 %v1214_v39, %v1366_v32 }
  0x4b   : > { %v274_v50 = vshrl.u32 %v1214_v39, %v262_v42  ;;  %v277_v51 = vshrl.u32 %v1215_v46, %v262_v42  ;;  %v378_v56 = vshrl.u32 %v1214_v39, %v1380_v49  ;;  %v1389_v57 = vshrl.u32 %v1215_v46, %v1380_v49 }
  0x4c   : > { %v171_v54 = vor.u32 %v170_v45, %v169_v38  ;;  %v174_v55 = vor.u32 %v173_v47, %v172_v40  ;;  %vm282_vm4 = vcmp.lt.s32.totalorder %v1373_v41, 4  ;;  %v160_v60 = vshll.u32 %v1216_v59, %v157_v30 }
  0x4d   : > { %v278_v58 = vor.u32 %v277_v51, %v276_v43  ;;  %v275_v63 = vor.u32 %v274_v50, %v273_v48  ;;  %vm386_vm5 = vcmp.lt.s32.totalorder %v1376_v44, 4  ;;  %v159_v0 = vshrl.u32 %v1216_v59, %v158_v36 }
  0x4e   : > { %v184_v62 = vsel %vm178_vm3, %v171_v54, 920167782  ;;  %v188_v1 = vsel %vm178_vm3, %v174_v55, 1326507024  ;;  %v1401_v2 = vor.u32 %v378_v56, %v377_v52  ;;  %v161_v7 = vshrl.u32 %v1217_v6, %v158_v36 }
  0x4f   : > { %v163_v8 = vshll.u32 %v1217_v6, %v157_v30  ;;  %v292_v11 = vsel %vm282_vm4, %v278_v58, 1326507024  ;;  %v382_v12 = vor.u32 %v1389_v57, %v1385_v53  ;;  %v164_v14 = vshrl.u32 %v1218_v13, %v158_v36 }
  0x50   : > { %v166_v15 = vshll.u32 %v1218_v13, %v157_v30  ;;  %v162_v16 = vor.u32 %v161_v7, %v160_v60  ;;  %v167_v17 = vshrl.u32 %v1213_v37, %v158_v36  ;;  %vm175_vm6 = vcmp.lt.s32.totalorder %v1364_v29, 1 }
  0x51   : > { %vm176_vm7 = vcmp.lt.s32.totalorder %v1364_v29, 2  ;;  %v165_v18 = vor.u32 %v164_v14, %v163_v8  ;;  %vm177_vm8 = vcmp.lt.s32.totalorder %v1364_v29, 3  ;;  %v263_v20 = vshrl.u32 %v1216_v59, %v262_v42 }
  0x52   : > { %v264_v21 = vshll.u32 %v1216_v59, %v261_v31  ;;  %v168_v22 = vor.u32 %v167_v17, %v166_v15  ;;  %v179_v23 = vsel %vm175_vm6, %v159_v0, %v162_v16  ;;  %v189_v24 = vsel %vm177_vm8, %v171_v54, %v188_v1 }
  0x53   : > { %v265_v25 = vshrl.u32 %v1217_v6, %v262_v42  ;;  %v183_v26 = vsel %vm175_vm6, %v162_v16, %v165_v18  ;;  %v267_v27 = vshll.u32 %v1217_v6, %v261_v31  ;;  %v268_v28 = vshrl.u32 %v1218_v13, %v262_v42 }
  0x54   : > { %v270_v30 = vshll.u32 %v1218_v13, %v261_v31  ;;  %v180_v35 = vsel %vm178_vm3, %v168_v22, 2102212464  ;;  %v185_v36 = vsel %vm177_vm8, %v168_v22, %v184_v62  ;;  %v187_v38 = vsel %vm175_vm6, %v165_v18, %v168_v22 }
  0x55   : > { %v266_v39 = vor.u32 %v265_v25, %v264_v21  ;;  %v181_v40 = vsel %vm177_vm8, %v165_v18, %v180_v35  ;;  %v186_v43 = vsel %vm176_vm7, %v183_v26, %v185_v36  ;;  %v190_v45 = vsel %vm176_vm7, %v187_v38, %v189_v24 }
  0x56   : > { %v269_v46 = vor.u32 %v268_v28, %v267_v27  ;;  %v182_v47 = vsel %vm176_vm7, %v179_v23, %v181_v40  ;;  %v1436_v31 = vmul.u32.u64.low %v1368_v33, %v190_v45  ;;  %v1437_v48 = vmul.u32.u64.high %v1368_v33, %v190_v45, %v1436_v31 }
  0x57   : > { %v271_v50 = vshrl.u32 %v1213_v37, %v262_v42  ;;  %v288_v51 = vsel %vm282_vm4, %v275_v63, 920167782  ;;  %v1443_v52 = vmul.u32.u64.low %v1368_v33, %v186_v43  ;;  %v1444_v53 = vmul.u32.u64.high %v1368_v33, %v186_v43, %v1443_v52 }
  0x58   : > { %vm279_vm9 = vcmp.lt.s32.totalorder %v1373_v41, 1  ;;  %v392_v29 = vsel %vm386_vm5, %v1401_v2, 920167782  ;;  %vm280_vm10 = vcmp.lt.s32.totalorder %v1373_v41, 2  ;;  %vm281_vm11 = vcmp.lt.s32.totalorder %v1373_v41, 3 }
  0x59   : > { %v272_v54 = vor.u32 %v271_v50, %v270_v30  ;;  %v198_v42 = vmul.u32 %v1368_v33, %v182_v47  ;;  %v283_v55 = vsel %vm279_vm9, %v263_v20, %v266_v39  ;;  %v287_v56 = vsel %vm279_vm9, %v266_v39, %v269_v46 }
  0x5a   : > { %v293_v57 = vsel %vm281_vm11, %v275_v63, %v292_v11  ;;  %vm200_vm12 = vc.u32 %v1437_v48, %v1443_v52  ;;  %v368_v62 = vshll.u32 %v1216_v59, %v1366_v32  ;;  %v201_v0 = vadd.s32 1, %v1444_v53 }
  0x5b   : > { %v284_v58 = vsel %vm282_vm4, %v272_v54, 2102212464  ;;  %v289_v60 = vsel %vm281_vm11, %v272_v54, %v288_v51  ;;  %v291_v7 = vsel %vm279_vm9, %v269_v46, %v272_v54  ;;  %v396_v15 = vsel %vm386_vm5, %v382_v12, 1326507024 }
  0x5c   : > { %v285_v33 = vsel %vm281_vm11, %v269_v46, %v284_v58  ;;  %v290_v1 = vsel %vm280_vm10, %v287_v56, %v289_v60  ;;  %v294_v8 = vsel %vm280_vm10, %v291_v7, %v293_v57  ;;  %v202_v16 = vsel %vm200_vm12, %v201_v0, %v1444_v53 }
  0x5d   : > { %v286_v63 = vsel %vm280_vm10, %v283_v55, %v285_v33  ;;  %v1474_v11 = vmul.u32.u64.low %v1370_v34, %v290_v1  ;;  %v1475_v14 = vmul.u32.u64.high %v1370_v34, %v290_v1, %v1474_v11  ;;  %v203_v20 = vadd.s32 %v202_v16, %v198_v42 }
  0x5e   : > { %v1482_v17 = vmul.u32.u64.low %v1370_v34, %v294_v8  ;;  %v1483_v18 = vmul.u32.u64.high %v1370_v34, %v294_v8, %v1482_v17  ;;  %v369_v21 = vshrl.u32 %v1217_v6, %v1380_v49  ;;  %v371_v41 = vshll.u32 %v1217_v6, %v1366_v32 }
  0x5f   : > { %v372_v22 = vshrl.u32 %v1218_v13, %v1380_v49  ;;  %v302_v23 = vmul.u32 %v1370_v34, %v286_v63  ;;  %v374_v12 = vshll.u32 %v1218_v13, %v1366_v32  ;;  %v375_v24 = vshrl.u32 %v1213_v37, %v1380_v49 }
  0x60   : > { %vm383_vm13 = vcmp.lt.s32.totalorder %v1376_v44, 1  ;;  %v204_v25 = vadd.s32 536870912, %v203_v20  ;;  %v305_v26 = vadd.s32 1, %v1475_v14  ;;  %v370_v27 = vor.u32 %v369_v21, %v368_v62 }
  0x61   : > { %v373_v28 = vor.u32 %v372_v22, %v371_v41  ;;  %vm304_vm14 = vc.u32 %v1483_v18, %v1474_v11  ;;  %v367_v6 = vshrl.u32 %v1216_v59, %v1380_v49  ;;  %v376_v34 = vor.u32 %v375_v24, %v374_v12 }
  0x62   : > { %vm385_vm15 = vcmp.lt.s32.totalorder %v1376_v44, 3  ;;  %v1503_v32 = vshrl.u32 %v204_v25, 30  ;;  %v306_v37 = vsel %vm304_vm14, %v305_v26, %v1475_v14  ;;  %vm384_vm0 = vcmp.lt.s32.totalorder %v1376_v44, 2 }
  0x63   : > { %v391_v13 = vsel %vm383_vm13, %v370_v27, %v373_v28  ;;  %v307_v30 = vadd.s32 %v306_v37, %v302_v23  ;;  %v388_v35 = vsel %vm386_vm5, %v376_v34, 2102212464  ;;  %v393_v36 = vsel %vm385_vm15, %v376_v34, %v392_v29 }
  0x64   : > { %v395_v49 = vsel %vm383_vm13, %v373_v28, %v376_v34  ;;  %v206_v59 = vshll.u32 %v1503_v32, 30  ;;  %v394_v39 = vsel %vm384_vm0, %v391_v13, %v393_v36  ;;  %v397_v40 = vsel %vm385_vm15, %v1401_v2, %v396_v15 }
  0x65   : > { %v308_v38 = vadd.s32 536870912, %v307_v30  ;;  %v387_v45 = vsel %vm383_vm13, %v367_v6, %v370_v27  ;;  %v389_v46 = vsel %vm385_vm15, %v373_v28, %v388_v35  ;;  %v398_v47 = vsel %vm384_vm0, %v395_v49, %v397_v40 }
  0x66   : > { %v207_v43 = vsub.s32 %v203_v20, %v206_v59  ;;  %v1524_v50 = vmul.u32.u64.low %v1393_v61, %v398_v47  ;;  %v1525_v51 = vmul.u32.u64.high %v1393_v61, %v398_v47, %v1524_v50  ;;  %v390_v42 = vsel %vm384_vm0, %v387_v45, %v389_v46 }
  0x67   : > { %v1521_v31 = vshrl.u32 %v308_v38, 30  ;;  %v1528_v29 = vmul.u32.u64.low %v1393_v61, %v394_v39  ;;  %v1529_v54 = vmul.u32.u64.high %v1393_v61, %v394_v39, %v1528_v29  ;;  %v406_v58 = vmul.u32 %v1393_v61, %v390_v42 }
  0x68   : > { %v209_v53 = vsub.s32 0, %v207_v43  ;;  %v199_v7 = vadd.s32 %v1443_v52, %v1437_v48  ;;  %v303_v41 = vadd.s32 %v1474_v11, %v1483_v18  ;;  %v229_v6 = vsub.s32 4, %v1503_v32 }
  0x69   : > { %v310_v2 = vshll.u32 %v1521_v31, 30  ;;  %vm408_vm1 = vc.u32 %v1525_v51, %v1528_v29  ;;  %v409_v62 = vadd.s32 1, %v1529_v54  ;;  %vm145_vm4 = vcmp.lt.s32.totalorder %v1344_v3, 0 }
  0x6a   : > { %v964_v55 = vmin.u32 %v209_v53, %v207_v43  ;;  %v230_v49 = vsel %vm145_vm4, %v229_v6, %v1503_v32  ;;  %v333_v39 = vsub.s32 4, %v1521_v31  ;;  %vm144_vm5 = vcmp.le.f32.partialorder %v143_v9, 0.7853982 }
  0x6b   : > { %v311_v56 = vsub.s32 %v307_v30, %v310_v2  ;;  %v410_v1 = vsel %vm408_vm1, %v409_v62, %v1529_v54  ;;  %v232_v50 = vsel %vm144_vm5, 0, %v230_v49  ;;  %vm249_vm6 = vcmp.lt.s32.totalorder %v1347_v4, 0 }
  0x6c   : > { %v211_v57 = vclz %v964_v55  ;;  %v411_v44 = vadd.s32 %v410_v1, %v406_v58  ;;  %v334_v32 = vsel %vm249_vm6, %v333_v39, %v1521_v31  ;;  %vm248_vm7 = vcmp.le.f32.partialorder %v247_v10, 0.7853982 }
  0x6d   : > { %v313_v60 = vsub.s32 0, %v311_v56  ;;  %v407_v9 = vadd.s32 %v1528_v29, %v1525_v51  ;;  %v236_v55 = vadd.s32 3, %v232_v50  ;;  %vm235_vm9 = vweird.f32 %v1344_v3 }
  0x6e   : > { %v965_v0 = vadd.s32 4294967294, %v211_v57  ;;  %v412_v17 = vadd.s32 536870912, %v411_v44  ;;  %vm353_vm10 = vcmp.lt.s32.totalorder %v1350_v5, 0  ;;  %vm339_vm12 = vweird.f32 %v1347_v4 }
  0x6f   : > { %v968_v33 = vmin.u32 %v313_v60, %v311_v56  ;;  %v237_v10 = vand.u32 3, %v236_v55  ;;  %vm1566_vm13 = vcmp.le.f32.partialorder %v351_v19, 0.7853982 }
  0x70   : > { %vm966_vm2 = vcmp.lt.s32.totalorder %v965_v0, 0  ;;  %v1544_v22 = vshrl.u32 %v412_v17, 30 }
  0x71   : > { %v214_v63 = vsel %vm966_vm2, 0, %v965_v0  ;;  %v315_v8 = vclz %v968_v33  ;;  %vm242_vm11 = vcmp.eq.s32.totalorder %v237_v10, 2  ;;  %vm239_vm15 = vcmp.eq.s32.totalorder %v237_v10, 0 }
  0x72   : > { %v215_v14 = vsub.s32 32, %v214_v63  ;;  %v216_v15 = vshll.u32 %v207_v43, %v214_v63  ;;  %v219_v61 = vsub.s32 4294967266, %v214_v63  ;;  %v414_v26 = vshll.u32 %v1544_v22, 30 }
  0x73   : > { %v969_v16 = vadd.s32 4294967294, %v315_v8  ;;  %v437_v17 = vsub.s32 4, %v1544_v22  ;;  %vm238_vm1 = vcmp.lt.s32.totalorder %v237_v10, 2 }
  0x74   : > { %v217_v20 = vshrl.u32 %v199_v7, %v215_v14  ;;  %v220_v21 = vadd.s32 127, %v219_v61  ;;  %v415_v13 = vsub.s32 %v411_v44, %v414_v26  ;;  %v548_v44 = vand.u32 3, %v232_v50 }
  0x75   : > { %vm970_vm3 = vcmp.lt.s32.totalorder %v969_v16, 0 }
  0x76   : > { %v218_v23 = vor.u32 %v217_v20, %v216_v15  ;;  %v221_v12 = vshll.u32 %v220_v21, 23  ;;  %v318_v48 = vsel %vm970_vm3, 0, %v969_v16  ;;  %v417_v35 = vsub.s32 0, %v415_v13 }
  0x77   : > { %v319_v52 = vsub.s32 32, %v318_v48  ;;  %v320_v24 = vshll.u32 %v311_v56, %v318_v48  ;;  %v323_v25 = vsub.s32 4294967266, %v318_v48  ;;  %v336_v56 = vsel %vm248_vm7, 0, %v334_v32 }
  0x78   : > { %v222_v27 = vor.u32 4788187, %v221_v12  ;;  %v225_v28 = vcvt.s32.f32 %v218_v23  ;;  %v972_v40 = vmin.u32 %v417_v35, %v415_v13  ;;  %v340_v33 = vadd.s32 3, %v336_v56 }
  0x79   : > { %v321_v34 = vshrl.u32 %v303_v41, %v319_v52  ;;  %v324_v37 = vadd.s32 127, %v323_v25  ;;  %v651_v51 = vand.u32 3, %v336_v56  ;;  %vm553_vm14 = vcmp.eq.s32.totalorder %v548_v44, 2 }
  0x7a   : > { %v223_v30 = vand.u32 2147483647, %v222_v27  ;;  %v419_v46 = vclz %v972_v40  ;;  %v341_v29 = vand.u32 3, %v340_v33  ;;  %vm550_vm0 = vcmp.eq.s32.totalorder %v548_v44, 0 }
  0x7b   : > { %v322_v11 = vor.u32 %v321_v34, %v320_v24  ;;  %v325_v18 = vshll.u32 %v324_v37, 23  ;;  %vm549_vm2 = vcmp.lt.s32.totalorder %v548_v44, 2  ;;  %vm653_vm3 = vcmp.eq.s32.totalorder %v651_v51, 0 }
  0x7c   : > { %v226_v36 = vmul.f32 %v225_v28, %v223_v30  ;;  %v973_v2 = vadd.s32 4294967294, %v419_v46  ;;  %v438_v24 = vsel %vm353_vm10, %v437_v17, %v1544_v22 }
  0x7d   : > { %v326_v59 = vor.u32 4788187, %v325_v18  ;;  %v329_v38 = vcvt.s32.f32 %v322_v11  ;;  %v440_v35 = vsel %vm1566_vm13, 0, %v438_v24 }
  0x7e   : > { %v227_v43 = vxor.u32 2147483648, %v226_v36  ;;  %vm974_vm8 = vcmp.lt.s32.totalorder %v973_v2, 0  ;;  %v754_v56 = vand.u32 3, %v440_v35 }
  0x7f   : > { %v327_v45 = vand.u32 2147483647, %v326_v59  ;;  %v422_v57 = vsel %vm974_vm8, 0, %v973_v2  ;;  %vm652_vm8 = vcmp.lt.s32.totalorder %v651_v51, 2 }
  0x80   : > { %v228_v47 = vsel %vm145_vm4, %v227_v43, %v226_v36  ;;  %v423_v60 = vsub.s32 32, %v422_v57  ;;  %v424_v62 = vshll.u32 %v415_v13, %v422_v57  ;;  %v427_v0 = vsub.s32 4294967266, %v422_v57 }
  0x81   : > { %v231_v53 = vsel %vm144_vm5, %v1344_v3, %v228_v47  ;;  %v330_v54 = vmul.f32 %v329_v38, %v327_v45  ;;  %vm342_vm4 = vcmp.lt.s32.totalorder %v341_v29, 2  ;;  %vm346_vm5 = vcmp.eq.s32.totalorder %v341_v29, 2 }
  0x82   : > { %1099 = vcosq.f32 %v231_v53  ;;  %v425_v1 = vshrl.u32 %v407_v9, %v423_v60  ;;  %v428_v7 = vadd.s32 127, %v427_v0  ;;  %v444_v43 = vadd.s32 3, %v440_v35 }
  0x83   : > { %1101 = vsinq.f32 %v231_v53  ;;  %v331_v42 = vxor.u32 2147483648, %v330_v54 }
  0x84   : > { %v426_v63 = vor.u32 %v425_v1, %v424_v62  ;;  %v429_v8 = vshll.u32 %v428_v7, 23  ;;  %v445_v57 = vand.u32 3, %v444_v43 }
  0x85   : > { %v332_v58 = vsel %vm249_vm6, %v331_v42, %v330_v54  ;;  %vm656_vm6 = vcmp.eq.s32.totalorder %v651_v51, 2 }
  0x86   : > { %v335_v31 = vsel %vm248_vm7, %v1347_v4, %v332_v58  ;;  %v430_v14 = vor.u32 4788187, %v429_v8  ;;  %v433_v15 = vcvt.s32.f32 %v426_v63  ;;  %vm343_vm7 = vcmp.eq.s32.totalorder %v341_v29, 0 }
  0x87   : > { %1103 = vcosq.f32 %v335_v31 }
  0x88   : > { %1105 = vsinq.f32 %v335_v31  ;;  %v431_v41 = vand.u32 2147483647, %v430_v14 }
  0x8a   : > { %v434_v48 = vmul.f32 %v433_v15, %v431_v41 }
  0x8c   : > { %v1100_v61 = vpop.eup %1099  ;;  %v435_v28 = vxor.u32 2147483648, %v434_v48 }
  0x8d   : > { %v1102_v20 = vpop.eup %1101  ;;  %v243_v21 = vxor.u32 2147483648, %v1100_v61 }
  0x8e   : > { %v240_v23 = vxor.u32 2147483648, %v1102_v20  ;;  %v436_v22 = vsel %vm353_vm10, %v435_v28, %v434_v48  ;;  %vm755_vm10 = vcmp.lt.s32.totalorder %v754_v56, 2 }
  0x8f   : > { %v244_v12 = vsel %vm242_vm11, %v243_v21, %v1102_v20  ;;  %v555_v19 = vsel %vm553_vm14, %v243_v21, %v1102_v20  ;;  %v439_v49 = vsel %vm1566_vm13, %v1350_v5, %v436_v22  ;;  %vm756_vm11 = vcmp.eq.s32.totalorder %v754_v56, 0 }
  0x90   : > { %v241_v52 = vsel %vm239_vm15, %v1100_v61, %v240_v23  ;;  %v552_v25 = vsel %vm550_vm0, %v1100_v61, %v240_v23  ;;  %1107 = vcosq.f32 %v439_v49  ;;  %vm759_vm13 = vcmp.eq.s32.totalorder %v754_v56, 2 }
  0x91   : > { %v1104_v26 = vpop.eup %1103  ;;  %v245_v27 = vsel %vm238_vm1, %v241_v52, %v244_v12  ;;  %v556_v6 = vsel %vm549_vm2, %v552_v25, %v555_v19  ;;  %1109 = vsinq.f32 %v439_v49  ;;  %vm447_vm14 = vcmp.eq.s32.totalorder %v445_v57, 0 }
  0x92   : > { %v1106_v34 = vpop.eup %1105  ;;  %v246_v37 = vsel %vm235_vm9, nan, %v245_v27  ;;  %v347_v13 = vxor.u32 2147483648, %v1104_v26  ;;  %v557_v30 = vsel %vm235_vm9, nan, %v556_v6  ;;  %vm443_vm9 = vweird.f32 %v1350_v5 }
  0x93   : > { %987 = vst [vmem:[%s1341_s25 + $0x18] sm:$0xff] %v246_v37  ;;  %v772_v11 = vmul.f32 2.0, %v246_v37  ;;  %v344_v18 = vxor.u32 2147483648, %v1106_v34  ;;  %990 = vst [vmem:[%s1341_s25 + $0x30] sm:$0xff] %v557_v30  ;;  %vm446_vm15 = vcmp.lt.s32.totalorder %v445_v57, 2 }
  0x94   : > { %v348_v36 = vsel %vm346_vm5, %v347_v13, %v1106_v34  ;;  %v658_v3 = vsel %vm656_vm6, %v347_v13, %v1106_v34 }
  0x95   : > { %v778_v59 = vmul.f32 %v772_v11, %v246_v37  ;;  %v345_v38 = vsel %vm343_vm7, %v1104_v26, %v344_v18  ;;  %v775_v39 = vmul.f32 %v772_v11, %v557_v30  ;;  %v655_v45 = vsel %vm653_vm3, %v1104_v26, %v344_v18 }
  0x96   : > { %v349_v40 = vsel %vm342_vm4, %v345_v38, %v348_v36  ;;  %v659_v47 = vsel %vm652_vm8, %v655_v45, %v658_v3 }
  0x97   : > { %v350_v46 = vsel %vm339_vm12, nan, %v349_v40  ;;  %993 = vst [vmem:[%s1341_s25 + $0x48] sm:$0xff] %v775_v39  ;;  %v781_v50 = vsub.f32 1.0, %v778_v59  ;;  %v792_v53 = vmul.f32 2.0, %v775_v39  ;;  %v660_v32 = vsel %vm339_vm12, nan, %v659_v47 }
  0x98   : > { %988 = vst [vmem:[%s1341_s25 + $0x20] sm:$0xff] %v350_v46  ;;  %v773_v54 = vmul.f32 2.0, %v350_v46  ;;  %991 = vst [vmem:[%s1341_s25 + $0x38] sm:$0xff] %v660_v32  ;;  %vm450_vm12 = vcmp.eq.s32.totalorder %v445_v57, 2 }
  0x99   : > { %996 = vst [vmem:[%s1341_s25 + $0x60] sm:$0xff] %v781_v50  ;;  %v795_v2 = vmul.f32 %v792_v53, %v781_v50  ;;  %v798_v42 = vmul.f32 %v792_v53, %v775_v39 }
  0x9a   : > { %v779_v9 = vmul.f32 %v773_v54, %v350_v46  ;;  %v776_v55 = vmul.f32 %v773_v54, %v660_v32  ;;  %v1108_v7 = vpop.eup %1107 }
  0x9b   : > { %999 = vst [vmem:[%s1341_s25 + $0x78] sm:$0xff] %v795_v2  ;;  %v801_v58 = vsub.f32 1.0, %v798_v42  ;;  %v812_v60 = vmul.f32 2.0, %v795_v2  ;;  %v1110_v63 = vpop.eup %1109  ;;  %v451_v8 = vxor.u32 2147483648, %v1108_v7 }
  0x9c   : > { %994 = vst [vmem:[%s1341_s25 + $0x50] sm:$0xff] %v776_v55  ;;  %v782_v62 = vsub.f32 1.0, %v779_v9  ;;  %v793_v0 = vmul.f32 2.0, %v776_v55  ;;  %v448_v14 = vxor.u32 2147483648, %v1110_v63 }
  0x9d   : > { %1002 = vst [vmem:[%s1341_s25 + $0x90] sm:$0xff] %v801_v58  ;;  %v815_v4 = vmul.f32 %v812_v60, %v801_v58  ;;  %v818_v31 = vmul.f32 %v812_v60, %v795_v2  ;;  %v452_v16 = vsel %vm450_vm12, %v451_v8, %v1110_v63  ;;  %v761_v17 = vsel %vm759_vm13, %v451_v8, %v1110_v63 }
  0x9e   : > { %997 = vst [vmem:[%s1341_s25 + $0x68] sm:$0xff] %v782_v62  ;;  %v796_v33 = vmul.f32 %v793_v0, %v782_v62  ;;  %v799_v1 = vmul.f32 %v793_v0, %v776_v55  ;;  %v449_v41 = vsel %vm447_vm14, %v1108_v7, %v448_v14  ;;  %v758_v23 = vsel %vm756_vm11, %v1108_v7, %v448_v14 }
  0x9f   : > { %1005 = vst [vmem:[%s1341_s25 + $0xa8] sm:$0xff] %v815_v4  ;;  %v821_v10 = vsub.f32 1.0, %v818_v31  ;;  %v832_v44 = vmul.f32 2.0, %v815_v4  ;;  %v453_v19 = vsel %vm446_vm15, %v449_v41, %v452_v16  ;;  %v762_v52 = vsel %vm755_vm10, %v758_v23, %v761_v17 }
  0xa0   : > { %1000 = vst [vmem:[%s1341_s25 + $0x80] sm:$0xff] %v796_v33  ;;  %v802_v51 = vsub.f32 1.0, %v799_v1  ;;  %v813_v29 = vmul.f32 2.0, %v796_v33  ;;  %v454_v26 = vsel %vm443_vm9, nan, %v453_v19  ;;  %v763_v27 = vsel %vm443_vm9, nan, %v762_v52 }
  0xa1   : > { %1008 = vst [vmem:[%s1341_s25 + $0xc0] sm:$0xff] %v821_v10  ;;  %v835_v15 = vmul.f32 %v832_v44, %v821_v10  ;;  %v838_v61 = vmul.f32 %v832_v44, %v815_v4  ;;  %989 = vst [vmem:[%s1341_s25 + $0x28] sm:$0xff] %v454_v26  ;;  %v774_v34 = vmul.f32 2.0, %v454_v26 }
  0xa2   : > { %1003 = vst [vmem:[%s1341_s25 + $0x98] sm:$0xff] %v802_v51  ;;  %v816_v20 = vmul.f32 %v813_v29, %v802_v51  ;;  %v819_v21 = vmul.f32 %v813_v29, %v796_v33  ;;  %992 = vst [vmem:[%s1341_s25 + $0x40] sm:$0xff] %v763_v27 }
  0xa3   : > { %1011 = vst [vmem:[%s1341_s25 + $0xd8] sm:$0xff] %v835_v15  ;;  %v841_v12 = vsub.f32 1.0, %v838_v61  ;;  %v852_v48 = vmul.f32 2.0, %v835_v15  ;;  %v780_v11 = vmul.f32 %v774_v34, %v454_v26  ;;  %v777_v18 = vmul.f32 %v774_v34, %v763_v27 }
  0xa4   : > { %1006 = vst [vmem:[%s1341_s25 + $0xb0] sm:$0xff] %v816_v20  ;;  %v822_v24 = vsub.f32 1.0, %v819_v21  ;;  %v833_v25 = vmul.f32 2.0, %v816_v20 }
  0xa5   : > { %1014 = vst [vmem:[%s1341_s25 + $0xf0] sm:$0xff] %v841_v12  ;;  %v855_v28 = vmul.f32 %v852_v48, %v841_v12  ;;  %v858_v6 = vmul.f32 %v852_v48, %v835_v15  ;;  %995 = vst [vmem:[%s1341_s25 + $0x58] sm:$0xff] %v777_v18  ;;  %v783_v35 = vsub.f32 1.0, %v780_v11  ;;  %v794_v36 = vmul.f32 2.0, %v777_v18 }
  0xa6   : > { %1009 = vst [vmem:[%s1341_s25 + $0xc8] sm:$0xff] %v822_v24  ;;  %v836_v37 = vmul.f32 %v833_v25, %v822_v24  ;;  %v839_v13 = vmul.f32 %v833_v25, %v816_v20 }
  0xa7   : > { %1017 = vst [vmem:[%s1341_s25 + $0x108] sm:$0xff] %v855_v28  ;;  %v861_v30 = vsub.f32 1.0, %v858_v6  ;;  %998 = vst [vmem:[%s1341_s25 + $0x70] sm:$0xff] %v783_v35  ;;  %v797_v59 = vmul.f32 %v794_v36, %v783_v35  ;;  %v800_v38 = vmul.f32 %v794_v36, %v777_v18 }
  0xa8   : > { %1012 = vst [vmem:[%s1341_s25 + $0xe0] sm:$0xff] %v836_v37  ;;  %v842_v5 = vsub.f32 1.0, %v839_v13  ;;  %v853_v22 = vmul.f32 2.0, %v836_v37 }
  0xa9   : > { %1020 = vst [vmem:[%s1341_s25 + $0x120] sm:$0xff] %v861_v30  ;;  %1001 = vst [vmem:[%s1341_s25 + $0x88] sm:$0xff] %v797_v59  ;;  %v803_v40 = vsub.f32 1.0, %v800_v38  ;;  %v814_v43 = vmul.f32 2.0, %v797_v59 }
  0xaa   : > { %1015 = vst [vmem:[%s1341_s25 + $0xf8] sm:$0xff] %v842_v5  ;;  %v856_v49 = vmul.f32 %v853_v22, %v842_v5  ;;  %v859_v3 = vmul.f32 %v853_v22, %v836_v37 }
  0xab   : > { %1004 = vst [vmem:[%s1341_s25 + $0xa0] sm:$0xff] %v803_v40  ;;  %v817_v45 = vmul.f32 %v814_v43, %v803_v40  ;;  %v820_v46 = vmul.f32 %v814_v43, %v797_v59 }
  0xac   : > { %1018 = vst [vmem:[%s1341_s25 + $0x110] sm:$0xff] %v856_v49  ;;  %v862_v39 = vsub.f32 1.0, %v859_v3 }
  0xad   : > { %1007 = vst [vmem:[%s1341_s25 + $0xb8] sm:$0xff] %v817_v45  ;;  %v823_v47 = vsub.f32 1.0, %v820_v46  ;;  %v834_v50 = vmul.f32 2.0, %v817_v45 }
  0xae   : > { %1021 = vst [vmem:[%s1341_s25 + $0x128] sm:$0xff] %v862_v39 }
  0xaf   : > { %1010 = vst [vmem:[%s1341_s25 + $0xd0] sm:$0xff] %v823_v47  ;;  %v837_v53 = vmul.f32 %v834_v50, %v823_v47  ;;  %v840_v54 = vmul.f32 %v834_v50, %v817_v45 }
  0xb1   : > { %1013 = vst [vmem:[%s1341_s25 + $0xe8] sm:$0xff] %v837_v53  ;;  %v843_v32 = vsub.f32 1.0, %v840_v54  ;;  %v854_v2 = vmul.f32 2.0, %v837_v53 }
  0xb3   : > { %1016 = vst [vmem:[%s1341_s25 + $0x100] sm:$0xff] %v843_v32  ;;  %v857_v42 = vmul.f32 %v854_v2, %v843_v32  ;;  %v860_v9 = vmul.f32 %v854_v2, %v837_v53 }
  0xb5   : > { %1019 = vst [vmem:[%s1341_s25 + $0x118] sm:$0xff] %v857_v42  ;;  %v863_v55 = vsub.f32 1.0, %v860_v9 }
  0xb7   : > { %1022 = vst [vmem:[%s1341_s25 + $0x130] sm:$0xff] %v863_v55 }
  0xb8   : > { %1154 = shalt.err (!%p1151_p2)
}
  0xb9   : > { %s1155_s14 = scalar_lea.hbm %s1640_s3, 4992  ;;  %s1159_s21 = scalar_lea.hbm %s1688_s1, 14976 }
  0xba   : > { %p1156_p4 = scmp.ne.s32.totalorder %s1640_s3, %s1155_s14  ;;  %p1160_p13 = scmp.lt.u32.totalorder %s1640_s3, %s1688_s1 }
  0xbb   : > { %p1161_p1 = scmp.lt.u32.totalorder %s1159_s21, %s1155_s14  ;;  %p1163_p6 = scmp.lt.u32.totalorder %s1155_s14, %s1640_s3 }
  0xbc   : > { %p1157_p5 = pnand %p1156_p4, %p1697_p10 }
  0xbd   : > { %p1162_p3 = por %p1161_p1, %p1160_p13 }
  0xbe   : > { %p1158_p7 = pneg %p1157_p5 }
  0xbf   : > { %p1164_p11 = por %p1163_p6, %p1162_p3 }
  0xc1   : > { %p1165_p12 = pnand %p1164_p11, %p1158_p7 }
  0xc3   : > { %1168 = shalt.err (!%p1165_p12)
}
  0xc4   : > { %s1220_s29 = smov 128   ;;  %s1221_s30 = smov 384  }
  0xc5   : > { %s1222_s24 = smov 8  }
  0xc6   : > { %1043 = dma.vmem_to_hbm [thread:$0]  (%p1697_p10), %s1642_s27, 4992, %s1640_s3, %s873_s10, %s1220_s29, %s1221_s30, %s1222_s24  }
  0xc7 PF: > { %p1054_p8 = scmp.ge.s32.totalorder %s1207_s9, 2  ;;  %s900_s25 = sand.u32 1, %s1195_s6  }
  0xc8   : > { %p1698_p9 = scmp.ne.s32.totalorder %s1692_s18, 0  ;;  %s901_s16 = scalar_lea.sflag [#allocation4], %s900_s25 }
  0xca   : > { %p1050_p0 = pnand %p1054_p8, %p1698_p9 }
  0xcc   : > { %1190 = dma.done.wait (!%p1050_p0), %s901_s16, 4992  }
  0xcd   : > { %1192 = vsyncadd (!%p1050_p0), %s901_s16, 4294962304  ;;  %p14_p2 = scmp.ge.s32.totalorder %s1258_s12, 5   ;;  %s1699_s6 = smov %s1199_s7 }
  0xce   : > { %s1700_s7 = smov %s1203_s8  ;;  %s1701_s8 = smov %s1270_s15 }
  0xcf   : > { %s1702_s9 = smov %s1258_s12  ;;  %16 = sbr.rel (!%p14_p2) target bundleno = 5 (0x5), region = 81 }
  0xd6   :  { %906 = vsyncpa [#allocation3], 1 }
  0xd7   :  { %908 = vsyncpa [#allocation3 + $0x1], 1 }
  0xd8   :  { %909 = vsyncpa [#allocation4], 1 }
  0xd9   :  { %911 = vsyncpa [#allocation4 + $0x1], 1 }

</bundles_post_ra>
